<compile_context>
chip_gen: v6e
topology: v6e:2x2x1
jax: 0.10.0
libtpu: 0.0.40
codegen_flags: <defaults>
</compile_context>

<pallas_src>
import functools

import jax
import jax.numpy as jnp
from jax.experimental import pallas as pl
from jax.experimental.pallas import tpu as pltpu


# --------------------------------------------------------------------------
# Kernel
# --------------------------------------------------------------------------
def _convlstm_kernel(slab_ref, w_ref, c_ref, h_out_ref, c_out_ref, *, HID):
    # slab_ref : (1, K_PAD, CHUNK) bf16  pre-shifted im2col slab (+ bias chan)
    # w_ref    : (4*HID, K_PAD)    bf16  packed conv weight (+ bias column)
    # c_ref    : (1, HID, CHUNK)   f32   current cell state chunk
    # h_out_ref: (1, HID, CHUNK)   f32
    # c_out_ref: (1, HID, CHUNK)   f32
    #
    # Single deep-K matmul: (4*HID, K_PAD) @ (K_PAD, CHUNK) -> f32 accumulator.
    # Bias is already folded in (constant-1 slab channel x bias weight column).
    acc = jnp.dot(w_ref[...], slab_ref[0],
                  preferred_element_type=jnp.float32)        # (4*HID, CHUNK)

    # Gates are contiguous sublane blocks (multiples of 8) -> cheap slices,
    # full-lane-width VPU/EUP ops.
    sig = jax.nn.sigmoid(acc[:3 * HID])                      # (3*HID, CHUNK)
    i = sig[0 * HID:1 * HID]
    f = sig[1 * HID:2 * HID]
    o = sig[2 * HID:3 * HID]
    g = jnp.tanh(acc[3 * HID:4 * HID])

    c_cur = c_ref[0]                                         # (HID, CHUNK) f32
    c_next = f * c_cur + i * g
    h_next = o * jnp.tanh(c_next)

    # Lane-dense, unmasked stores (CHUNK is a multiple of 128).
    c_out_ref[0] = c_next
    h_out_ref[0] = h_next.astype(h_out_ref.dtype)


# --------------------------------------------------------------------------
# One-time parameter packing (hoist out of the recurrent step)
# --------------------------------------------------------------------------
def pack_convlstm_params(w_oihw, bias, *, kernel_size, input_dim, hidden_dim):
    """Pack PyTorch Conv2d (OIHW) weight + bias for the Pallas step.

    Returns w_packed of shape (4*hidden_dim, K_PAD) bf16 where
      column (dy*KW+dx)*CTOT + c  = w[:, c, dy, dx]
      column K_STACK              = bias          (matched by a 1.0 slab channel)
      remaining columns           = 0             (matched by 0.0 slab channels)
    """
    KH, KW = kernel_size
    CTOT = input_dim + hidden_dim
    O = 4 * hidden_dim
    K_STACK = KH * KW * CTOT
    K_PAD = -(-(K_STACK + 1) // 16) * 16          # +1 bias channel, 16-aligned

    # (O, C, KH, KW) -> (O, KH, KW, C) -> (O, KH*KW*C): matches slab stacking.
    w_flat = jnp.transpose(w_oihw.astype(jnp.float32), (0, 2, 3, 1))
    w_flat = w_flat.reshape(O, K_STACK)
    w_packed = jnp.zeros((O, K_PAD), jnp.float32)
    w_packed = w_packed.at[:, :K_STACK].set(w_flat)
    w_packed = w_packed.at[:, K_STACK].set(bias.astype(jnp.float32))
    return w_packed.astype(jnp.bfloat16)


# --------------------------------------------------------------------------
# Per-step wrapper
# --------------------------------------------------------------------------
def _build_slab(x_nchw, h_nchw, *, kernel_size, k_pad):
    """Pre-shifted im2col slab: (B, K_PAD, H*W) bf16, tap shifts baked in."""
    B, Cin, H, W = x_nchw.shape
    HID = h_nchw.shape[1]
    KH, KW = kernel_size
    ph, pw = KH // 2, KW // 2
    CTOT = Cin + HID
    K_STACK = KH * KW * CTOT

    combined = jnp.concatenate([x_nchw, h_nchw], axis=1).astype(jnp.bfloat16)
    comb_pad = jnp.pad(combined, ((0, 0), (0, 0), (ph, ph), (pw, pw)))
    # One shifted view per (dy, dx) tap, stacked along channels.
    taps = [comb_pad[:, :, dy:dy + H, dx:dx + W]
            for dy in range(KH) for dx in range(KW)]
    slab = jnp.concatenate(taps, axis=1).reshape(B, K_STACK, H * W)
    # Bias channel (constant 1.0) + zero padding up to K_PAD.
    ones = jnp.ones((B, 1, H * W), jnp.bfloat16)
    zeros = jnp.zeros((B, k_pad - K_STACK - 1, H * W), jnp.bfloat16)
    return jnp.concatenate([slab, ones, zeros], axis=1)


def conv_lstm_cell_pallas(x_nchw, h_nchw, c_nchw, w_packed, *, kernel_size,
                          hidden_dim):
    """Pallas ConvLSTMCell forward. Inputs/outputs follow PyTorch NCHW."""
    B, Cin, H, W = x_nchw.shape
    HID = hidden_dim
    KH, KW = kernel_size
    # PyTorch's padding = kernel//2 only preserves spatial size for odd kernels.
    assert KH % 2 == 1 and KW % 2 == 1, "ConvLSTMCell assumes odd kernel sizes"
    HW = H * W
    K_PAD = w_packed.shape[1]

    # 256 lanes per chunk fills the 2x256 MXUs on v6e/v7x; fall back to 128,
    # then to the full image (lane-masked stores) only for odd tiny shapes.
    if HW % 256 == 0:
        CHUNK = 256
    elif HW % 128 == 0:
        CHUNK = 128
    else:
        CHUNK = HW
    n_chunks = HW // CHUNK

    slab = _build_slab(x_nchw, h_nchw, kernel_size=kernel_size, k_pad=K_PAD)
    c_flat = c_nchw.reshape(B, HID, HW)           # free reshape, no transpose

    kernel = functools.partial(_convlstm_kernel, HID=HID)

    h_flat, c_next_flat = pl.pallas_call(
        kernel,
        out_shape=(jax.ShapeDtypeStruct((B, HID, HW), jnp.float32),
                   jax.ShapeDtypeStruct((B, HID, HW), jnp.float32)),
        grid_spec=pltpu.PrefetchScalarGridSpec(
            num_scalar_prefetch=0,
            grid=(B, n_chunks),                   # both axes fully parallel
            in_specs=[
                pl.BlockSpec((1, K_PAD, CHUNK), lambda b, j: (b, 0, j)),
                pl.BlockSpec((4 * HID, K_PAD), lambda b, j: (0, 0)),
                pl.BlockSpec((1, HID, CHUNK), lambda b, j: (b, 0, j)),
            ],
            out_specs=[
                pl.BlockSpec((1, HID, CHUNK), lambda b, j: (b, 0, j)),
                pl.BlockSpec((1, HID, CHUNK), lambda b, j: (b, 0, j)),
            ],
        ),
        compiler_params=pltpu.CompilerParams(
            dimension_semantics=("parallel", "parallel")),
    )(slab, w_packed, c_flat)

    # Free reshapes back to NCHW (no transposes anywhere).
    return (h_flat.reshape(B, HID, H, W),
            c_next_flat.reshape(B, HID, H, W))


# --------------------------------------------------------------------------
# Pure-JAX reference (mirrors the PyTorch forward, f32)
# --------------------------------------------------------------------------
def conv_lstm_cell_ref(x_nchw, h_nchw, c_nchw, w_oihw, bias):
    combined = jnp.concatenate([x_nchw, h_nchw], axis=1)
    out = jax.lax.conv_general_dilated(
        combined, w_oihw, window_strides=(1, 1), padding="SAME",
        dimension_numbers=("NCHW", "OIHW", "NCHW"))
    out = out + bias[None, :, None, None]
    HID = h_nchw.shape[1]
    cc_i, cc_f, cc_o, cc_g = jnp.split(out, 4, axis=1)
    i = jax.nn.sigmoid(cc_i)
    f = jax.nn.sigmoid(cc_f)
    o = jax.nn.sigmoid(cc_o)
    g = jnp.tanh(cc_g)
    c_next = f * c_nchw + i * g
    h_next = o * jnp.tanh(c_next)
    return h_next, c_next


if __name__ == "__main__":
    # Small config consistent with ConvLSTMCell: input_size=(16,16),
    # input_dim=4, hidden_dim=32, kernel_size=(3,3), bias=True, batch=2.
    B, Cin, H, W = 2, 4, 16, 16
    HID = 32
    KH, KW = 3, 3

    key = jax.random.PRNGKey(0)
    kx, kh, kc, kw_, kb = jax.random.split(key, 5)

    x = jax.random.normal(kx, (B, Cin, H, W), jnp.float32)
    h_cur = jax.random.normal(kh, (B, HID, H, W), jnp.float32)
    c_cur = jax.random.normal(kc, (B, HID, H, W), jnp.float32)

    # Synthetic conv parameters (PyTorch OIHW layout):
    # nn.Conv2d(in=Cin+HID, out=4*HID, kernel=(3,3), padding=(1,1), bias=True)
    w = jax.random.normal(kw_, (4 * HID, Cin + HID, KH, KW), jnp.float32) * 0.05
    b = jax.random.normal(kb, (4 * HID,), jnp.float32) * 0.05

    # Parameter packing is hoisted out of the step (done once per model).
    w_packed = pack_convlstm_params(w, b, kernel_size=(KH, KW),
                                    input_dim=Cin, hidden_dim=HID)

    h_next, c_next = conv_lstm_cell_pallas(x, h_cur, c_cur, w_packed,
                                           kernel_size=(KH, KW),
                                           hidden_dim=HID)
    jax.block_until_ready((h_next, c_next))

    h_ref, c_ref = conv_lstm_cell_ref(x, h_cur, c_cur, w, b)
    assert h_next.shape == (B, HID, H, W) and c_next.shape == (B, HID, H, W)
    # bf16 MXU operands -> relaxed tolerance vs the f32 reference.
    assert jnp.allclose(h_next, h_ref, atol=5e-2, rtol=5e-2)
    assert jnp.allclose(c_next, c_ref, atol=5e-2, rtol=5e-2)

    print("KERNEL_OK")
</pallas_src>

<mosaic_0001>
module attributes {stable_mosaic.version = 11 : i64} {
  func.func @_convlstm_kernel(%arg0: i32, %arg1: i32, %arg2: memref<1x336x256xbf16, #tpu.memory_space<vmem>>, %arg3: memref<128x336xbf16, #tpu.memory_space<vmem>>, %arg4: memref<1x32x256xf32, #tpu.memory_space<vmem>>, %arg5: memref<1x32x256xf32, #tpu.memory_space<vmem>>, %arg6: memref<1x32x256xf32, #tpu.memory_space<vmem>>) attributes {dimension_semantics = [#tpu.dimension_semantics<parallel>, #tpu.dimension_semantics<parallel>], iteration_bounds = array<i64: 2, 1>, scalar_prefetch = 0 : i64, scratch_operands = 0 : i64, tpu.core_type = #tpu.core_type<tc>, window_params = [{transform_indices = @transform_0, window_bounds = array<i64: 1, 336, 256>}, {pipeline_mode = #tpu.pipeline_mode<synchronous>, transform_indices = @transform_1, window_bounds = array<i64: 128, 336>}, {transform_indices = @transform_2, window_bounds = array<i64: 1, 32, 256>}, {transform_indices = @transform_3, window_bounds = array<i64: 1, 32, 256>}, {transform_indices = @transform_4, window_bounds = array<i64: 1, 32, 256>}]} {
    %c0 = arith.constant 0 : index
    %c0_0 = arith.constant 0 : index
    %0 = vector.load %arg3[%c0, %c0_0] : memref<128x336xbf16, #tpu.memory_space<vmem>>, vector<128x336xbf16>
    %c0_1 = arith.constant 0 : index
    %c0_2 = arith.constant 0 : index
    %c0_3 = arith.constant 0 : index
    %1 = vector.load %arg2[%c0_1, %c0_2, %c0_3] : memref<1x336x256xbf16, #tpu.memory_space<vmem>>, vector<1x336x256xbf16>
    %2 = vector.shape_cast %1 : vector<1x336x256xbf16> to vector<336x256xbf16>
    %cst = arith.constant dense<0.000000e+00> : vector<128x256xf32>
    %3 = tpu.matmul %0, %2, %cst {dimension_numbers = #tpu.dot_dimension_numbers<[1], [0], [0], [1], [0, 0, 1, 1], [], []>} : vector<128x336xbf16>, vector<336x256xbf16>, vector<128x256xf32> -> vector<128x256xf32>
    %4 = vector.extract_strided_slice %3 {offsets = [0, 0], sizes = [96, 256], strides = [1, 1]} : vector<128x256xf32> to vector<96x256xf32>
    %5 = arith.negf %4 : vector<96x256xf32>
    %6 = math.exp %5 : vector<96x256xf32>
    %cst_4 = arith.constant 1.000000e+00 : f32
    %7 = vector.broadcast %cst_4 : f32 to vector<96x256xf32>
    %8 = arith.addf %7, %6 : vector<96x256xf32>
    %9 = arith.divf %7, %8 : vector<96x256xf32>
    %10 = vector.extract_strided_slice %9 {offsets = [0, 0], sizes = [32, 256], strides = [1, 1]} : vector<96x256xf32> to vector<32x256xf32>
    %11 = vector.extract_strided_slice %9 {offsets = [32, 0], sizes = [32, 256], strides = [1, 1]} : vector<96x256xf32> to vector<32x256xf32>
    %12 = vector.extract_strided_slice %9 {offsets = [64, 0], sizes = [32, 256], strides = [1, 1]} : vector<96x256xf32> to vector<32x256xf32>
    %13 = vector.extract_strided_slice %3 {offsets = [96, 0], sizes = [32, 256], strides = [1, 1]} : vector<128x256xf32> to vector<32x256xf32>
    %14 = math.tanh %13 : vector<32x256xf32>
    %c0_5 = arith.constant 0 : index
    %c0_6 = arith.constant 0 : index
    %c0_7 = arith.constant 0 : index
    %15 = vector.load %arg4[%c0_5, %c0_6, %c0_7] : memref<1x32x256xf32, #tpu.memory_space<vmem>>, vector<1x32x256xf32>
    %16 = vector.shape_cast %15 : vector<1x32x256xf32> to vector<32x256xf32>
    %17 = arith.mulf %11, %16 : vector<32x256xf32>
    %18 = arith.mulf %10, %14 : vector<32x256xf32>
    %19 = arith.addf %17, %18 : vector<32x256xf32>
    %20 = math.tanh %19 : vector<32x256xf32>
    %21 = arith.mulf %12, %20 : vector<32x256xf32>
    %c0_8 = arith.constant 0 : index
    %c0_9 = arith.constant 0 : index
    %c0_10 = arith.constant 0 : index
    %22 = vector.load %arg6[%c0_8, %c0_9, %c0_10] : memref<1x32x256xf32, #tpu.memory_space<vmem>>, vector<1x32x256xf32>
    %23 = vector.shape_cast %22 : vector<1x32x256xf32> to vector<32x256xf32>
    %24 = vector.shape_cast %19 : vector<32x256xf32> to vector<1x32x256xf32>
    tpu.vector_store %arg6[%c0_8, %c0_9, %c0_10], %24 {strides = array<i32>} : memref<1x32x256xf32, #tpu.memory_space<vmem>>, vector<1x32x256xf32>,
    %c0_11 = arith.constant 0 : index
    %c0_12 = arith.constant 0 : index
    %c0_13 = arith.constant 0 : index
    %25 = vector.load %arg5[%c0_11, %c0_12, %c0_13] : memref<1x32x256xf32, #tpu.memory_space<vmem>>, vector<1x32x256xf32>
    %26 = vector.shape_cast %25 : vector<1x32x256xf32> to vector<32x256xf32>
    %27 = vector.shape_cast %21 : vector<32x256xf32> to vector<1x32x256xf32>
    tpu.vector_store %arg5[%c0_11, %c0_12, %c0_13], %27 {strides = array<i32>} : memref<1x32x256xf32, #tpu.memory_space<vmem>>, vector<1x32x256xf32>,
    return
  }
  func.func @transform_0(%arg0: i32, %arg1: i32) -> (i32, i32, i32) {
    %c0_i32 = arith.constant 0 : i32
    %c0_i32_0 = arith.constant 0 : i32
    return %arg0, %c0_i32, %arg1 : i32, i32, i32
  }
  func.func @transform_1(%arg0: i32, %arg1: i32) -> (i32, i32) {
    %c0_i32 = arith.constant 0 : i32
    %c0_i32_0 = arith.constant 0 : i32
    %c0_i32_1 = arith.constant 0 : i32
    return %c0_i32, %c0_i32_0 : i32, i32
  }
  func.func @transform_2(%arg0: i32, %arg1: i32) -> (i32, i32, i32) {
    %c0_i32 = arith.constant 0 : i32
    %c0_i32_0 = arith.constant 0 : i32
    return %arg0, %c0_i32, %arg1 : i32, i32, i32
  }
  func.func @transform_3(%arg0: i32, %arg1: i32) -> (i32, i32, i32) {
    %c0_i32 = arith.constant 0 : i32
    %c0_i32_0 = arith.constant 0 : i32
    return %arg0, %c0_i32, %arg1 : i32, i32, i32
  }
  func.func @transform_4(%arg0: i32, %arg1: i32) -> (i32, i32, i32) {
    %c0_i32 = arith.constant 0 : i32
    %c0_i32_0 = arith.constant 0 : i32
    return %arg0, %c0_i32, %arg1 : i32, i32, i32
  }
}

</mosaic_0001>

<bundles_post_ra>
// kernel: tpu_custom_call.1
= control target key start
LH: loop header
LB: loop body
LE: loop exit
PB: predicated region body
PF: predicated region fallthrough
CT: control target
= control target key end

     0   :  { %10 = vsyncpa [#allocation3], 0  ;;  %s2333_s0 = inlined_call_operand.hbm [shape: bf16[2,336,256], index: 0, kind: input, shape index: {}]   ;;  %s2334_s1 = inlined_call_operand.vmem [shape: bf16[128,336], index: 1, kind: input, shape index: {}]   ;;  %s2335_s2 = inlined_call_operand.vmem [shape: f32[2,32,256], index: 2, kind: input, shape index: {}]   ;;  %s2336_s3 = inlined_call_operand.hbm [shape: f32[2,32,256], index: 3, kind: output, shape index: {0}]   ;;  %s2337_s4 = inlined_call_operand.hbm [shape: f32[2,32,256], index: 4, kind: output, shape index: {1}]  }
   0x1   :  { %12 = vsyncpa [#allocation3 + $0x1], 0 }
   0x2   :  { %13 = vsyncpa [#allocation4], 0 }
   0x3   :  { %15 = vsyncpa [#allocation4 + $0x1], 0 }
   0x4   :  { %16 = vsyncpa [#allocation7], 0 }
   0x5   :  { %18 = vsyncpa [#allocation7 + $0x1], 0  ;;  %s1927_s15 = smov 0   ;;  %s1929_s16 = smov 0  }
   0x6   :  { %s1931_s17 = smov 0   ;;  %s1933_s18 = smov 0  }
   0x7   :  { %s1935_s19 = smov 0   ;;  %s1937_s20 = smov 0  }
   0x8 LB: > { %s1337_s21 = sadd.s32 4294967295, %s1892_s20   ;;  %s1338_s22 = sadd.s32 4294967294, %s1892_s20   ;;  %s1892_s20 = sphi %s1937_s20, %s24_s20   ;;  %s1888_s19 = sphi %s1935_s19, %s2348_s19   ;;  %s1884_s18 = sphi %s1933_s18, %s2347_s18   ;;  %s1880_s17 = sphi %s1931_s17, %s2346_s17   ;;  %s1876_s16 = sphi %s1929_s16, %s2345_s16   ;;  %s1872_s15 = sphi %s1927_s15, %s2344_s15  }
   0x9   : > { %s36_s23 = sadd.s32 1, %s1888_s19  ;;  %s45_s24 = sadd.s32 1, %s1880_s17 }
   0xa   : > { %p38_p0 = scmp.ge.s32.totalorder %s36_s23, 2  ;;  %p52_p1 = scmp.ne.s32.totalorder %s1880_s17, %s1876_s16 }
   0xb   : > { %p53_p2 = scmp.eq.s32.totalorder %s1892_s20, 0  ;;  %p58_p3 = scmp.ne.s32.totalorder %s1876_s16, %s1872_s15 }
   0xc   : > { %s2350_s23 = smov (%p38_p0, %s36_s23), 0  ;;  %p59_p5 = scmp.eq.s32.totalorder %s1337_s21, 0 }
   0xd   : > { %p1968_p4 = por %p53_p2, %p52_p1  ;;  %s40_s26 = ssub.s32 %s1888_s19, %s2350_s23 }
   0xe   : > { %p133_p6 = scmp.eq.s32.totalorder %s1337_s21, 1  ;;  %p43_p7 = scmp.eq.s32.totalorder %s40_s26, 0 }
   0xf   : > { %p1974_p8 = por %p59_p5, %p58_p3  ;;  %p139_p10 = scmp.eq.s32.totalorder %s1338_s22, 1 }
  0x10   : > { %p1978_p9 = por %p133_p6, %p52_p1  ;;  %p1476_p13 = scmp.lt.s32.totalorder %s1892_s20, 2 }
  0x11   : > { %s1983_s29 = scalar_select %p43_p7, %s1880_s17, %s45_s24  }
  0x12   : > { %p1985_p11 = por %p139_p10, %p58_p3  ;;  %s190_s5 = sand.u32 1, %s1880_s17  }
  0x13   : > { %s1456_s6 = smul.u32 336, %s190_s5  ;;  %p1995_p0 = pnand %p1476_p13, %p1968_p4 }
  0x14   : > { %s1457_s7 = smul.u32 5376, %s1888_s19  ;;  %p1342_p1 = scmp.ge.s32.totalorder %s1892_s20, 1 }
  0x15   : > { %s194_s12 = scalar_lea.vmem [#allocation2], %s1456_s6  ;;  %s191_s14 = scalar_lea.sflag [#allocation3], %s190_s5 }
  0x16   : > { %s202_s11 = scalar_lea.hbm %s2333_s0, %s1457_s7  ;;  %s203_s13 = sshll.u32 %s194_s12, 4  ;;  %s204_s13 = int_to_ptr.vmem [resolvable:$true] %s203_s13 }
  0x17   : > { %p1756_p2 = pneg %p1995_p0  ;;  %s1767_s21 = scalar_lea.vmem %s204_s13, 5376 }
  0x18   : > { %p1768_p3 = scmp.ne.s32.totalorder %s204_s13, %s1767_s21  ;;  %s1894_s22 = smov [#allocation2]  }
  0x19   : > { %s1772_s24 = sshll.u32 %s1894_s22, 4  ;;  %s1773_s24 = int_to_ptr.vmem [resolvable:$false] %s1772_s24 }
  0x1a   : > { %p1770_p5 = pnand %p1768_p3, %p1756_p2  ;;  %s1774_s25 = scalar_lea.vmem %s1773_s24, 10752 }
  0x1b   : > { %p1775_p4 = scmp.lt.s32.totalorder %s204_s13, %s1773_s24  ;;  %p1776_p7 = scmp.lt.s32.totalorder %s1774_s25, %s1767_s21 }
  0x1c   : > { %p1771_p6 = pneg %p1770_p5 }
  0x1d   : > { %p1777_p10 = por %p1776_p7, %p1775_p4 }
  0x1f   : > { %p1778_p13 = pnand %p1777_p10, %p1771_p6 }
  0x21   : > { %1781 = shalt.err (!%p1778_p13)
}
  0x22   : > { %s1895_s26 = smov 128   ;;  %s1896_s5 = smov 8  }
  0x23   : > { %1468 = dma.hbm_to_vmem [thread:$0]  (!%p1995_p0), %s202_s11, 5376, %s204_s13, %s191_s14, %s1895_s26, %s1895_s26, %s1896_s5  }
  0x24   : > { %p224_p12 = scmp.lt.s32.totalorder %s1892_s20, 3 }
  0x26   : > { %p225_p2 = pnand %p1342_p1, %p224_p12 }
  0x27   : > { %s2011_s6 = sand.u32 (!%p225_p2), 1, %s1876_s16  }
  0x28   : > { %228 = sbr.rel (%p225_p2) target bundleno = 426 (0x1aa), region = 32  ;;  %s231_s9 = scalar_lea.sflag (!%p225_p2), [#allocation3], %s2011_s6 }
  0x29   : > { %s1458_s7 = smul.u32 (!%p225_p2), 336, %s2011_s6 }
  0x2b   : > { %s2015_s10 = scalar_lea.vmem (!%p225_p2), [#allocation2], %s1458_s7 }
  0x2d   : > { %1859 = dma.done.wait (%p1974_p8), %s231_s9, 5376  }
  0x2e   : > { %1861 = vsyncadd (%p1974_p8), %s231_s9, 4294961920  ;;  %v1897_v0 = vmov 0   ;;  %v1531_v1 = vld [vmem:[%s2015_s10 + $0x74] ss:$8 sps:$4 sm:$0xff]   ;;  %v1533_v2 = vld [vmem:[%s2015_s10 + $0x70] ss:$8 sps:$4 sm:$0xff]  }
  0x2f   : > { %861 = vmatprep.mubr.bf16.mxu1 %v1897_v0  ;;  %716 = vmatprep.subr.bf16.mxu0 %v1531_v1  ;;  %v1534_v3 = vld [vmem:[%s2015_s10 + $0x64] ss:$8 sps:$4 sm:$0xff]   ;;  %v1536_v4 = vld [vmem:[%s2015_s10 + $0x60] ss:$8 sps:$4 sm:$0xff]   ;;  %v1537_v5 = vld [vmem:[%s2015_s10 + $0x54] ss:$8 sps:$4 sm:$0xff]  }
  0x30   : > { %717 = vmatpush1.bf16.msra.mxu0 %v1533_v2  ;;  %v1539_v6 = vld [vmem:[%s2015_s10 + $0x50] ss:$8 sps:$4 sm:$0xff]   ;;  %v1540_v7 = vld [vmem:[%s2015_s10 + $0x44] ss:$8 sps:$4 sm:$0xff]   ;;  %v1542_v8 = vld [vmem:[%s2015_s10 + $0x40] ss:$8 sps:$4 sm:$0xff]  }
  0x31   : > { %718 = vmatprep.subr.bf16.mxu0 %v1534_v3  ;;  %v1543_v9 = vld [vmem:[%s2015_s10 + $0x34] ss:$8 sps:$4 sm:$0xff]   ;;  %v1561_v10 = vld [vmem:[%s2015_s10 + $0x144] ss:$8 sps:$4 sm:$0xff]   ;;  %v1563_v11 = vld [vmem:[%s2015_s10 + $0x140] ss:$8 sps:$4 sm:$0xff]  }
  0x32   : > { %v1545_v12 = vld [vmem:[%s2015_s10 + $0x30] ss:$8 sps:$4 sm:$0xff]   ;;  %v1546_v13 = vld [vmem:[%s2015_s10 + $0x24] ss:$8 sps:$4 sm:$0xff]   ;;  %835 = vmatprep.subr.bf16.mxu1 %v1561_v10  ;;  %v1567_v14 = vld [vmem:[%s2015_s10 + $0x134] ss:$8 sps:$4 sm:$0xff]  }
  0x33   : > { %836 = vmatpush1.bf16.msra.mxu1 %v1563_v11  ;;  %v1569_v15 = vld [vmem:[%s2015_s10 + $0x130] ss:$8 sps:$4 sm:$0xff]   ;;  %v1548_v16 = vld [vmem:[%s2015_s10 + $0x20] ss:$8 sps:$4 sm:$0xff]   ;;  %v1573_v17 = vld [vmem:[%s2015_s10 + $0x124] ss:$8 sps:$4 sm:$0xff]  }
  0x34   : > { %719 = vmatpush1.bf16.msra.mxu0 %v1536_v4  ;;  %837 = vmatprep.subr.bf16.mxu1 %v1567_v14  ;;  %v1549_v18 = vld [vmem:[%s2015_s10 + $0x14] ss:$8 sps:$4 sm:$0xff]   ;;  %v1575_v19 = vld [vmem:[%s2015_s10 + $0x120] ss:$8 sps:$4 sm:$0xff]   ;;  %v1551_v21 = vld [vmem:[%s2015_s10 + $0x10] ss:$8 sps:$4 sm:$0xff]  }
  0x35   : > { %720 = vmatprep.subr.bf16.mxu0 %v1537_v5  ;;  %v1579_v20 = vld [vmem:[%s2015_s10 + $0x114] ss:$8 sps:$4 sm:$0xff]   ;;  %v1552_v22 = vld [vmem:[%s2015_s10 + $0x4] ss:$8 sps:$4 sm:$0xff]   ;;  %v1581_v23 = vld [vmem:[%s2015_s10 + $0x110] ss:$8 sps:$4 sm:$0xff]  }
  0x36   : > { %v1585_v24 = vld [vmem:[%s2015_s10 + $0x104] ss:$8 sps:$4 sm:$0xff]   ;;  %v1554_v25 = vld [vmem:[%s2015_s10] ss:$8 sps:$4 sm:$0xff]   ;;  %v1555_v26 = vld [vmem:[%s2015_s10 + $0xf4] ss:$8 sps:$4 sm:$0xff]  }
  0x37   : > { %838 = vmatpush1.bf16.msra.mxu1 %v1569_v15  ;;  %v1587_v27 = vld [vmem:[%s2015_s10 + $0x100] ss:$8 sps:$4 sm:$0xff]   ;;  %v1557_v29 = vld [vmem:[%s2015_s10 + $0xf0] ss:$8 sps:$4 sm:$0xff]   ;;  %v1558_v30 = vld [vmem:[%s2015_s10 + $0xe4] ss:$8 sps:$4 sm:$0xff]  }
  0x38   : > { %721 = vmatpush1.bf16.msra.mxu0 %v1539_v6  ;;  %839 = vmatprep.subr.bf16.mxu1 %v1573_v17  ;;  %v1597_v28 = vld [vmem:[%s2334_s1 + $0x4] ss:$12 sps:$4 sm:$0xff]   ;;  %v1591_v31 = vld [vmem:[%s2334_s1 + $0x8] ss:$12 sps:$4 sm:$0xff]   ;;  %vm691_vm0 = vcmask 654336   ;;  %p275_p8 = scmp.lt.s32.totalorder %s1884_s18, 1 }
  0x39   : > { %722 = vmatprep.subr.bf16.mxu0 %v1540_v7  ;;  %748 = vmatprep.mubr.bf16.mxu0 %v1597_v28  ;;  %v1560_v32 = vld [vmem:[%s2015_s10 + $0xe0] ss:$8 sps:$4 sm:$0xff]   ;;  %v1564_v33 = vld [vmem:[%s2015_s10 + $0xd4] ss:$8 sps:$4 sm:$0xff]   ;;  %v1566_v34 = vld [vmem:[%s2015_s10 + $0xd0] ss:$8 sps:$4 sm:$0xff]  }
  0x3a   : > { %v1570_v35 = vld [vmem:[%s2015_s10 + $0xc4] ss:$8 sps:$4 sm:$0xff]   ;;  %v1572_v37 = vld [vmem:[%s2015_s10 + $0xc0] ss:$8 sps:$4 sm:$0xff]   ;;  %v1576_v38 = vld [vmem:[%s2015_s10 + $0xb4] ss:$8 sps:$4 sm:$0xff]  }
  0x3b   : > { %840 = vmatpush1.bf16.msra.mxu1 %v1575_v19  ;;  %v1598_v36 = vld [vmem:[%s2334_s1 + $0x20] ss:$12 sps:$4 sm:$0xff]   ;;  %v1602_v41 = vld [vmem:[%s2334_s1 + $0x38] ss:$12 sps:$4 sm:$0xff]   ;;  %v1606_v46 = vld [vmem:[%s2334_s1 + $0x50] ss:$12 sps:$4 sm:$0xff]  }
  0x3c   : > { %723 = vmatpush1.bf16.msra.mxu0 %v1542_v8  ;;  %841 = vmatprep.subr.bf16.mxu1 %v1579_v20  ;;  %v1578_v39 = vld [vmem:[%s2015_s10 + $0xb0] ss:$8 sps:$4 sm:$0xff]   ;;  %v1582_v40 = vld [vmem:[%s2015_s10 + $0xa4] ss:$8 sps:$4 sm:$0xff]   ;;  %v1584_v42 = vld [vmem:[%s2015_s10 + $0xa0] ss:$8 sps:$4 sm:$0xff]  }
  0x3d   : > { %724 = vmatprep.subr.bf16.mxu0 %v1543_v9  ;;  %v1588_v43 = vld [vmem:[%s2015_s10 + $0x94] ss:$8 sps:$4 sm:$0xff]   ;;  %v1590_v44 = vld [vmem:[%s2015_s10 + $0x90] ss:$8 sps:$4 sm:$0xff]   ;;  %v1592_v45 = vld [vmem:[%s2015_s10 + $0x84] ss:$8 sps:$4 sm:$0xff]  }
  0x3e   : > { %v1594_v47 = vld [vmem:[%s2015_s10 + $0x80] ss:$8 sps:$4 sm:$0xff]   ;;  %s276_s12 = scalar_select %p275_p8, %s1884_s18, 1 }
  0x3f   : > { %842 = vmatpush1.bf16.msra.mxu1 %v1581_v23  ;;  %v1595_v48 = vld [vmem:[%s2334_s1] ss:$12 sps:$4 sm:$0xff]   ;;  %v1599_v49 = vld [vmem:[%s2334_s1 + $0x1c] ss:$12 sps:$4 sm:$0xff]   ;;  %v1601_v51 = vld [vmem:[%s2334_s1 + $0x18] ss:$12 sps:$4 sm:$0xff]  }
  0x40   : > { %725 = vmatpush1.bf16.msra.mxu0 %v1545_v12  ;;  %843 = vmatprep.subr.bf16.mxu1 %v1585_v24  ;;  %v1610_v50 = vld [vmem:[%s2334_s1 + $0x68] ss:$12 sps:$4 sm:$0xff]   ;;  %v1614_v53 = vld [vmem:[%s2334_s1 + $0x80] ss:$12 sps:$4 sm:$0xff]   ;;  %v1605_v54 = vld [vmem:[%s2334_s1 + $0x30] ss:$12 sps:$4 sm:$0xff]  }
  0x41   : > { %726 = vmatprep.subr.bf16.mxu0 %v1546_v13  ;;  %v1603_v52 = vld [vmem:[%s2334_s1 + $0x34] ss:$12 sps:$4 sm:$0xff]   ;;  %v1607_v55 = vld [vmem:[%s2334_s1 + $0x4c] ss:$12 sps:$4 sm:$0xff]   ;;  %v1611_v58 = vld [vmem:[%s2334_s1 + $0x64] ss:$12 sps:$4 sm:$0xff]  }
  0x42   : > { %v1618_v56 = vld [vmem:[%s2334_s1 + $0x98] ss:$12 sps:$4 sm:$0xff]   ;;  %v1609_v57 = vld [vmem:[%s2334_s1 + $0x48] ss:$12 sps:$4 sm:$0xff]   ;;  %v1622_v59 = vld [vmem:[%s2334_s1 + $0xb0] ss:$12 sps:$4 sm:$0xff]  }
  0x43   : > { %844 = vmatpush1.bf16.msra.mxu1 %v1587_v27  ;;  %v1613_v60 = vld [vmem:[%s2334_s1 + $0x60] ss:$12 sps:$4 sm:$0xff]   ;;  %v1615_v61 = vld [vmem:[%s2334_s1 + $0x7c] ss:$12 sps:$4 sm:$0xff]   ;;  %v1617_v62 = vld [vmem:[%s2334_s1 + $0x78] ss:$12 sps:$4 sm:$0xff]  }
  0x44   : > { %727 = vmatpush1.bf16.msra.mxu0 %v1548_v16  ;;  %v1619_v63 = vld [vmem:[%s2334_s1 + $0x94] ss:$12 sps:$4 sm:$0xff]   ;;  %v1623_v1 = vld [vmem:[%s2334_s1 + $0xac] ss:$12 sps:$4 sm:$0xff]   ;;  %s1453_s13 = sshll.u32 %s276_s12, 6  ;;  %s1343_s24 = sshll.u32 %s2011_s6, 6 }
  0x45   : > { %728 = vmatprep.subr.bf16.mxu0 %v1549_v18  ;;  %v1625_v2 = vld [vmem:[%s2334_s1 + $0xa8] ss:$12 sps:$4 sm:$0xff]   ;;  %s2207_s22 = scalar_lea.vmem %s2335_s2, %s1453_s13  ;;  %s2219_s25 = scalar_lea.vmem [#allocation6], %s1343_s24 }
  0x46   : > { %1413 = vmatmul.mubr.msk.bf16.vlgmr.msra.gmra.mxu1 %vm691_vm0, %v1591_v31  ;;  %s1454_s26 = sshll.u32 %s1884_s18, 10  ;;  %s1197_s5 = sshll.u32 %s2219_s25, 4  ;;  %s2246_s5 = int_to_ptr.vmem [resolvable:$true] %s1197_s5 }
  0x47   : > { %871 = vmatprep.mubr.bf16.mxu1 %v1897_v0  ;;  %s2244_s27 = scalar_lea.hbm %s2337_s4, %s1454_s26  ;;  %s1164_s8 = scalar_lea.sflag [#allocation7], %s2011_s6 }
  0x48   : > { %729 = vmatpush1.bf16.msra.mxu0 %v1551_v21  ;;  %s1782_s10 = scalar_lea.vmem %s2246_s5, 1024  ;;  %s1898_s11 = smov [#allocation6]  }
  0x49   : > { %730 = vmatprep.subr.bf16.mxu0 %v1552_v22  ;;  %p1783_p12 = scmp.ne.s32.totalorder %s2246_s5, %s1782_s10  ;;  %s1786_s12 = sshll.u32 %s1898_s11, 4  ;;  %s1787_s12 = int_to_ptr.vmem [resolvable:$false] %s1786_s12 }
  0x4a   : > { %s1788_s13 = scalar_lea.vmem %s1787_s12, 2048  ;;  %p1789_p3 = scmp.lt.s32.totalorder %s2246_s5, %s1787_s12 }
  0x4b   : > { %p1784_p0 = pnand %p1783_p12, %p1978_p9  ;;  %p1790_p5 = scmp.lt.s32.totalorder %s1788_s13, %s1782_s10 }
  0x4c   : > { %731 = vmatpush1.bf16.msra.mxu0 %v1554_v25 }
  0x4d   : > { %732 = vmatprep.subr.bf16.mxu0 %v1555_v26  ;;  %p1785_p1 = pneg %p1784_p0  ;;  %p1791_p6 = por %p1790_p5, %p1789_p3 }
  0x4e   : > { %1414 = vmatmul.mubr.msk.bf16.gmra.mxu1 %vm691_vm0, %v1598_v36 }
  0x4f   : > { %881 = vmatprep.mubr.bf16.mxu1 %v1897_v0  ;;  %p1792_p4 = pnand %p1791_p6, %p1785_p1 }
  0x50   : > { %733 = vmatpush2.bf16.msra.mxu0 %v1557_v29 }
  0x51   : > { %734 = vmatprep.subr.bf16.mxu0 %v1558_v30 }
  0x54   : > { %735 = vmatpush2.bf16.msra.mxu0 %v1560_v32 }
  0x55   : > { %736 = vmatprep.subr.bf16.mxu0 %v1564_v33 }
  0x56   : > { %1415 = vmatmul.mubr.msk.bf16.gmra.mxu1 %vm691_vm0, %v1602_v41 }
  0x57   : > { %891 = vmatprep.mubr.bf16.mxu1 %v1897_v0 }
  0x58   : > { %737 = vmatpush2.bf16.msra.mxu0 %v1566_v34 }
  0x59   : > { %738 = vmatprep.subr.bf16.mxu0 %v1570_v35 }
  0x5c   : > { %739 = vmatpush2.bf16.msra.mxu0 %v1572_v37 }
  0x5d   : > { %740 = vmatprep.subr.bf16.mxu0 %v1576_v38 }
  0x5e   : > { %1416 = vmatmul.mubr.msk.bf16.gmra.mxu1 %vm691_vm0, %v1606_v46 }
  0x5f   : > { %901 = vmatprep.mubr.bf16.mxu1 %v1897_v0 }
  0x60   : > { %741 = vmatpush2.bf16.msra.mxu0 %v1578_v39 }
  0x61   : > { %742 = vmatprep.subr.bf16.mxu0 %v1582_v40 }
  0x64   : > { %743 = vmatpush2.bf16.msra.mxu0 %v1584_v42 }
  0x65   : > { %744 = vmatprep.subr.bf16.mxu0 %v1588_v43 }
  0x66   : > { %1417 = vmatmul.mubr.msk.bf16.gmra.mxu1 %vm691_vm0, %v1610_v50 }
  0x67   : > { %911 = vmatprep.mubr.bf16.mxu1 %v1897_v0 }
  0x68   : > { %745 = vmatpush2.bf16.msra.mxu0 %v1590_v44 }
  0x69   : > { %746 = vmatprep.subr.bf16.mxu0 %v1592_v45 }
  0x6c   : > { %747 = vmatpush2.bf16.msra.mxu0 %v1594_v47 }
  0x6e   : > { %1418 = vmatmul.mubr.msk.bf16.gmra.mxu1 %vm691_vm0, %v1614_v53 }
  0x6f   : > { %749 = vmatmul.mubr.bf16.vlgmr.msra.gmra.mxu0 %v1595_v48  ;;  %921 = vmatprep.mubr.bf16.mxu1 %v1897_v0 }
  0x70   : > { %758 = vmatprep.mubr.bf16.mxu0 %v1599_v49 }
  0x76   : > { %1419 = vmatmul.mubr.msk.bf16.gmra.mxu1 %vm691_vm0, %v1618_v56 }
  0x77   : > { %759 = vmatmul.mubr.bf16.gmra.mxu0 %v1601_v51  ;;  %931 = vmatprep.mubr.bf16.mxu1 %v1897_v0  ;;  %v1621_v0 = vld [vmem:[%s2334_s1 + $0x90] ss:$12 sps:$4 sm:$0xff]  }
  0x78   : > { %768 = vmatprep.mubr.bf16.mxu0 %v1603_v52 }
  0x7e   : > { %1420 = vmatmul.mubr.msk.bf16.gmra.mxu1 %vm691_vm0, %v1622_v59 }
  0x7f   : > { %769 = vmatmul.mubr.bf16.gmra.mxu0 %v1605_v54 }
  0x80   : > { %778 = vmatprep.mubr.bf16.mxu0 %v1607_v55 }
  0x87   : > { %779 = vmatmul.mubr.bf16.gmra.mxu0 %v1609_v57 }
  0x88   : > { %788 = vmatprep.mubr.bf16.mxu0 %v1611_v58 }
  0x8f   : > { %789 = vmatmul.mubr.bf16.gmra.mxu0 %v1613_v60 }
  0x90   : > { %798 = vmatprep.mubr.bf16.mxu0 %v1615_v61 }
  0x97   : > { %799 = vmatmul.mubr.bf16.gmra.mxu0 %v1617_v62 }
  0x98   : > { %808 = vmatprep.mubr.bf16.mxu0 %v1619_v63 }
  0x9f   : > { %809 = vmatmul.mubr.bf16.gmra.mxu0 %v1621_v0 }
  0xa0   : > { %818 = vmatprep.mubr.bf16.mxu0 %v1623_v1 }
  0xa7   : > { %819 = vmatmul.mubr.bf16.gmra.mxu0 %v1625_v2 }
 0x106   : > { %v863_v3 = vpop.f32.mrf.mxu1 }
 0x108   : > { %v865_v4 = vpop.f32.mrf.mxu1 }
 0x10a   : > { %v867_v5 = vpop.f32.mrf.mxu1 }
 0x10c   : > { %v869_v6 = vpop.f32.mrf.mxu1 }
 0x10e   : > { %v873_v7 = vpop.f32.mrf.mxu1 }
 0x110   : > { %v875_v8 = vpop.f32.mrf.mxu1 }
 0x112   : > { %v877_v9 = vpop.f32.mrf.mxu1 }
 0x114   : > { %v879_v10 = vpop.f32.mrf.mxu1 }
 0x116   : > { %v883_v11 = vpop.f32.mrf.mxu1 }
 0x118   : > { %v885_v12 = vpop.f32.mrf.mxu1 }
 0x11a   : > { %v887_v13 = vpop.f32.mrf.mxu1 }
 0x11c   : > { %v889_v14 = vpop.f32.mrf.mxu1 }
 0x11e   : > { %v893_v15 = vpop.f32.mrf.mxu1 }
 0x120   : > { %v2151_v16 = vpop.f32.mrf.mxu1 }
 0x122   : > { %v2153_v17 = vpop.f32.mrf.mxu1 }
 0x124   : > { %v2155_v19 = vpop.f32.mrf.mxu1 }
 0x126   : > { %v2157_v21 = vpop.f32.mrf.mxu1 }
 0x128   : > { %v2159_v26 = vpop.f32.mrf.mxu1 }
 0x12a   : > { %v2161_v34 = vpop.f32.mrf.mxu1 }
 0x12c   : > { %v2163_v42 = vpop.f32.mrf.mxu1 }
 0x12e   : > { %v2165_v49 = vpop.f32.mrf.mxu1 }
 0x12f   : > { %v750_v18 = vpop.f32.mrf.mxu0 }
 0x130   : > { %v864_v23 = vadd.f32 %v863_v3, %v750_v18  ;;  %v2167_v56 = vpop.f32.mrf.mxu1 }
 0x131   : > { %v752_v20 = vpop.f32.mrf.mxu0 }
 0x132   : > { %v866_v25 = vadd.f32 %v865_v4, %v752_v20  ;;  %v1421_v29 = vmul.f32 -1.442695, %v864_v23  ;;  %v2169_v0 = vpop.f32.mrf.mxu1 }
 0x133   : > { %v754_v22 = vpop.f32.mrf.mxu0 }
 0x134   : > { %v868_v27 = vadd.f32 %v867_v5, %v754_v22  ;;  %v1422_v32 = vmul.f32 -1.442695, %v866_v25  ;;  %1626 = vpow2.f32 %v1421_v29 }
 0x135   : > { %v756_v24 = vpop.f32.mrf.mxu0 }
 0x136   : > { %v870_v30 = vadd.f32 %v869_v6, %v756_v24  ;;  %v1423_v35 = vmul.f32 -1.442695, %v868_v27  ;;  %1628 = vpow2.f32 %v1422_v32 }
 0x137   : > { %v760_v28 = vpop.f32.mrf.mxu0 }
 0x138   : > { %v874_v33 = vadd.f32 %v873_v7, %v760_v28  ;;  %v1424_v38 = vmul.f32 -1.442695, %v870_v30  ;;  %1630 = vpow2.f32 %v1423_v35 }
 0x139   : > { %v762_v31 = vpop.f32.mrf.mxu0 }
 0x13a   : > { %v876_v36 = vadd.f32 %v875_v8, %v762_v31  ;;  %v1425_v41 = vmul.f32 -1.442695, %v874_v33  ;;  %1632 = vpow2.f32 %v1424_v38 }
 0x13b   : > { %v764_v37 = vpop.f32.mrf.mxu0 }
 0x13c   : > { %v878_v39 = vadd.f32 %v877_v9, %v764_v37  ;;  %v1426_v43 = vmul.f32 -1.442695, %v876_v36  ;;  %1634 = vpow2.f32 %v1425_v41 }
 0x13d   : > { %v766_v40 = vpop.f32.mrf.mxu0 }
 0x13e   : > { %v1427_v46 = vmul.f32 -1.442695, %v878_v39  ;;  %1636 = vpow2.f32 %v1426_v43  ;;  %v880_v57 = vadd.f32 %v879_v10, %v766_v40 }
 0x13f   : > { %v770_v44 = vpop.f32.mrf.mxu0 }
 0x140   : > { %v884_v45 = vadd.f32 %v883_v11, %v770_v44  ;;  %1638 = vpow2.f32 %v1427_v46  ;;  %v1428_v2 = vmul.f32 -1.442695, %v880_v57  ;;  %v2172_v11 = vpop.f32.mrf.mxu1 }
 0x141   : > { %v772_v47 = vpop.f32.mrf.mxu0  ;;  %v1627_v62 = vpop.eup %1626 }
 0x142   : > { %v886_v48 = vadd.f32 %v885_v12, %v772_v47  ;;  %v1429_v51 = vmul.f32 -1.442695, %v884_v45  ;;  %v1014_v7 = vadd.f32 1.0, %v1627_v62  ;;  %v923_v27 = vpop.f32.mrf.mxu1 }
 0x143   : > { %v774_v50 = vpop.f32.mrf.mxu0  ;;  %v1629_v1 = vpop.eup %1628 }
 0x144   : > { %v888_v52 = vadd.f32 %v887_v13, %v774_v50  ;;  %v1430_v54 = vmul.f32 -1.442695, %v886_v48  ;;  %1640 = vpow2.f32 %v1429_v51  ;;  %v1015_v10 = vadd.f32 1.0, %v1629_v1  ;;  %v925_v37 = vpop.f32.mrf.mxu1 }
 0x145   : > { %v776_v53 = vpop.f32.mrf.mxu0  ;;  %v1631_v4 = vpop.eup %1630 }
 0x146   : > { %v890_v55 = vadd.f32 %v889_v14, %v776_v53  ;;  %v1431_v59 = vmul.f32 -1.442695, %v888_v52  ;;  %1642 = vpow2.f32 %v1430_v54  ;;  %v1016_v13 = vadd.f32 1.0, %v1631_v4 }
 0x147   : > { %v780_v58 = vpop.f32.mrf.mxu0  ;;  %v1633_v9 = vpop.eup %1632 }
 0x148   : > { %v894_v60 = vadd.f32 %v893_v15, %v780_v58  ;;  %v1432_v63 = vmul.f32 -1.442695, %v890_v55  ;;  %1644 = vpow2.f32 %v1431_v59  ;;  %v1017_v22 = vadd.f32 1.0, %v1633_v9 }
 0x149   : > { %v782_v61 = vpop.f32.mrf.mxu0  ;;  %v1635_v12 = vpop.eup %1634 }
 0x14a   : > { %v1433_v5 = vmul.f32 -1.442695, %v894_v60  ;;  %v896_v6 = vadd.f32 %v2151_v16, %v782_v61  ;;  %1646 = vpow2.f32 %v1432_v63  ;;  %v1018_v24 = vadd.f32 1.0, %v1635_v12 }
 0x14b   : > { %v784_v3 = vpop.f32.mrf.mxu0  ;;  %1648 = vpow2.f32 %v1428_v2  ;;  %v1637_v15 = vpop.eup %1636 }
 0x14c   : > { %1650 = vpow2.f32 %v1433_v5  ;;  %v1434_v18 = vmul.f32 -1.442695, %v896_v6  ;;  %v898_v20 = vadd.f32 %v2153_v17, %v784_v3  ;;  %v1019_v28 = vadd.f32 1.0, %v1637_v15 }
 0x14d   : > { %v786_v8 = vpop.f32.mrf.mxu0  ;;  %1652 = vrcp.f32 %v1014_v7  ;;  %v1639_v16 = vpop.eup %1638 }
 0x14e   : > { %1654 = vrcp.f32 %v1015_v10  ;;  %v900_v25 = vadd.f32 %v2155_v19, %v786_v8  ;;  %v1435_v31 = vmul.f32 -1.442695, %v898_v20  ;;  %v1020_v33 = vadd.f32 1.0, %v1639_v16 }
 0x14f   : > { %v790_v14 = vpop.f32.mrf.mxu0  ;;  %1656 = vrcp.f32 %v1016_v13 }
 0x150   : > { %v904_v29 = vadd.f32 %v2157_v21, %v790_v14  ;;  %1658 = vpow2.f32 %v1434_v18  ;;  %v1436_v36 = vmul.f32 -1.442695, %v900_v25 }
 0x151   : > { %v792_v23 = vpop.f32.mrf.mxu0  ;;  %v1641_v32 = vpop.eup %1640  ;;  %1660 = vrcp.f32 %v1017_v22 }
 0x152   : > { %v906_v17 = vadd.f32 %v2159_v26, %v792_v23  ;;  %1662 = vrcp.f32 %v1018_v24  ;;  %v1437_v19 = vmul.f32 -1.442695, %v904_v29  ;;  %v1022_v41 = vadd.f32 1.0, %v1641_v32  ;;  %v927_v26 = vpop.f32.mrf.mxu1 }
 0x153   : > { %v794_v30 = vpop.f32.mrf.mxu0  ;;  %v1643_v38 = vpop.eup %1642  ;;  %1664 = vrcp.f32 %v1019_v28 }
 0x154   : > { %v908_v39 = vadd.f32 %v2161_v34, %v794_v30  ;;  %1666 = vpow2.f32 %v1435_v31  ;;  %v1438_v43 = vmul.f32 -1.442695, %v906_v17  ;;  %v1023_v46 = vadd.f32 1.0, %v1643_v38  ;;  %v929_v59 = vpop.f32.mrf.mxu1 }
 0x155   : > { %v796_v35 = vpop.f32.mrf.mxu0  ;;  %v1645_v21 = vpop.eup %1644  ;;  %1668 = vrcp.f32 %v1020_v33 }
 0x156   : > { %v910_v44 = vadd.f32 %v2163_v42, %v796_v35  ;;  %1670 = vpow2.f32 %v1436_v36  ;;  %v1439_v48 = vmul.f32 -1.442695, %v908_v39  ;;  %v1024_v34 = vadd.f32 1.0, %v1645_v21  ;;  %v933_v6 = vpop.f32.mrf.mxu1 }
 0x157   : > { %v800_v40 = vpop.f32.mrf.mxu0  ;;  %v1647_v47 = vpop.eup %1646  ;;  %1672 = vpow2.f32 %v1437_v19 }
 0x158   : > { %v914_v50 = vadd.f32 %v2165_v49, %v800_v40  ;;  %v2181_v52 = vpop.eup %1648  ;;  %1674 = vrcp.f32 %v1022_v41  ;;  %v1440_v54 = vmul.f32 -1.442695, %v910_v44  ;;  %v1025_v42 = vadd.f32 1.0, %v1647_v47  ;;  %v935_v22 = vpop.f32.mrf.mxu1 }
 0x159   : > { %v802_v45 = vpop.f32.mrf.mxu0  ;;  %v1651_v53 = vpop.eup %1650  ;;  %1676 = vpow2.f32 %v1438_v43  ;;  %v1021_v41 = vadd.f32 1.0, %v2181_v52 }
 0x15a   : > { %v2183_v57 = vpop.eup %1652  ;;  %1678 = vrcp.f32 %v1023_v46  ;;  %v916_v58 = vadd.f32 %v2167_v56, %v802_v45  ;;  %v1441_v49 = vmul.f32 -1.442695, %v914_v50  ;;  %v1026_v63 = vadd.f32 1.0, %v1651_v53  ;;  %v937_v33 = vpop.f32.mrf.mxu1  ;;  %v1094_v46 = vld [vmem:[%s2207_s22] sm:$0xff]  ;;  %v1095_v50 = vld [vmem:[%s2207_s22 + $0x8] sm:$0xff] }
 0x15b   : > { %v804_v51 = vpop.f32.mrf.mxu0  ;;  %v2186_v60 = vpop.eup %1654  ;;  %1680 = vpow2.f32 %v1439_v48 }
 0x15c   : > { %v2188_v62 = vpop.eup %1656  ;;  %1682 = vrcp.f32 %v1024_v34  ;;  %v1442_v5 = vmul.f32 -1.442695, %v916_v58  ;;  %v918_v56 = vadd.f32 %v2169_v0, %v804_v51  ;;  %v939_v21 = vpop.f32.mrf.mxu1 }
 0x15d   : > { %v806_v55 = vpop.f32.mrf.mxu0  ;;  %v1659_v1 = vpop.eup %1658  ;;  %1684 = vpow2.f32 %v1440_v54 }
 0x15e   : > { %v2190_v4 = vpop.eup %1660  ;;  %1686 = vrcp.f32 %v1025_v42  ;;  %v1027_v12 = vadd.f32 1.0, %v1659_v1  ;;  %v1443_v0 = vmul.f32 -1.442695, %v918_v56  ;;  %v920_v20 = vadd.f32 %v2172_v11, %v806_v55  ;;  %v1096_v55 = vld [vmem:[%s2207_s22 + $0x10] sm:$0xff]  ;;  %v1097_v1 = vld [vmem:[%s2207_s22 + $0x18] sm:$0xff] }
 0x15f   : > { %v810_v61 = vpop.f32.mrf.mxu0  ;;  %v2194_v7 = vpop.eup %1662  ;;  %1688 = vpow2.f32 %v1441_v49 }
 0x160   : > { %v924_v2 = vadd.f32 %v923_v27, %v810_v61  ;;  %v2196_v10 = vpop.eup %1664  ;;  %1690 = vrcp.f32 %v1026_v63  ;;  %v1444_v32 = vmul.f32 -1.442695, %v920_v20 }
 0x161   : > { %v812_v3 = vpop.f32.mrf.mxu0  ;;  %v1667_v13 = vpop.eup %1666 }
 0x162   : > { %v926_v8 = vadd.f32 %v925_v37, %v812_v3  ;;  %1692 = vtanh.f32 %v924_v2  ;;  %v2198_v18 = vpop.eup %1668  ;;  %v1028_v27 = vadd.f32 1.0, %v1667_v13 }
 0x163   : > { %v814_v9 = vpop.f32.mrf.mxu0  ;;  %1694 = vpow2.f32 %v1442_v5  ;;  %v1671_v23 = vpop.eup %1670 }
 0x164   : > { %v928_v14 = vadd.f32 %v927_v26, %v814_v9  ;;  %1696 = vtanh.f32 %v926_v8  ;;  %v1673_v25 = vpop.eup %1672  ;;  %v1029_v37 = vadd.f32 1.0, %v1671_v23 }
 0x165   : > { %v816_v15 = vpop.f32.mrf.mxu0  ;;  %1698 = vrcp.f32 %v1027_v12  ;;  %v1675_v28 = vpop.eup %1674  ;;  %v1030_v48 = vadd.f32 1.0, %v1673_v25  ;;  %v1100_v25 = vld [vmem:[%s2207_s22 + $0x30] sm:$0xff] }
 0x166   : > { %v930_v16 = vadd.f32 %v929_v59, %v816_v15  ;;  %1700 = vtanh.f32 %v928_v14  ;;  %v1677_v31 = vpop.eup %1676  ;;  %v1102_v34 = vmul.f32 %v1675_v28, %v1094_v46 }
 0x167   : > { %v820_v24 = vpop.f32.mrf.mxu0  ;;  %1702 = vpow2.f32 %v1443_v0  ;;  %v1679_v11 = vpop.eup %1678  ;;  %v1031_v54 = vadd.f32 1.0, %v1677_v31  ;;  %v1099_v0 = vld [vmem:[%s2207_s22 + $0x28] sm:$0xff] }
 0x168   : > { %v934_v29 = vadd.f32 %v933_v6, %v820_v24  ;;  %1704 = vtanh.f32 %v930_v16  ;;  %v1681_v36 = vpop.eup %1680  ;;  %v1103_v59 = vmul.f32 %v1679_v11, %v1095_v50  ;;  %v1098_v6 = vld [vmem:[%s2207_s22 + $0x20] sm:$0xff] }
 0x169   : > { %v822_v30 = vpop.f32.mrf.mxu0  ;;  %1706 = vrcp.f32 %v1028_v27  ;;  %v1683_v38 = vpop.eup %1682  ;;  %v1032_v63 = vadd.f32 1.0, %v1681_v36 }
 0x16a   : > { %v936_v17 = vadd.f32 %v935_v22, %v822_v30  ;;  %1708 = vtanh.f32 %v934_v29  ;;  %v1685_v40 = vpop.eup %1684  ;;  %v1104_v3 = vmul.f32 %v1683_v38, %v1096_v55 }
 0x16b   : > { %v824_v35 = vpop.f32.mrf.mxu0  ;;  %1710 = vpow2.f32 %v1444_v32  ;;  %v1687_v43 = vpop.eup %1686  ;;  %v1101_v32 = vld [vmem:[%s2207_s22 + $0x38] sm:$0xff] }
 0x16c   : > { %v938_v19 = vadd.f32 %v937_v33, %v824_v35  ;;  %1712 = vtanh.f32 %v936_v17  ;;  %v1689_v45 = vpop.eup %1688  ;;  %v1105_v12 = vmul.f32 %v1687_v43, %v1097_v1 }
 0x16d   : > { %v826_v39 = vpop.f32.mrf.mxu0  ;;  %1714 = vrcp.f32 %v1029_v37  ;;  %v1691_v26 = vpop.eup %1690  ;;  %v1034_v15 = vadd.f32 1.0, %v1689_v45 }
 0x16e   : > { %v940_v44 = vadd.f32 %v939_v21, %v826_v39  ;;  %1716 = vtanh.f32 %v938_v19  ;;  %v1106_v22 = vmul.f32 %v1691_v26, %v1098_v6 }
 0x16f   : > { %v1693_v47 = vpop.eup %1692  ;;  %1718 = vrcp.f32 %v1021_v41 }
 0x170   : > { %v1695_v51 = vpop.eup %1694  ;;  %v1110_v52 = vmul.f32 %v1693_v47, %v2183_v57  ;;  %1720 = vtanh.f32 %v940_v44 }
 0x171   : > { %v1697_v53 = vpop.eup %1696  ;;  %1722 = vrcp.f32 %v1030_v48  ;;  %v1035_v24 = vadd.f32 1.0, %v1695_v51 }
 0x172   : > { %v1699_v42 = vpop.eup %1698  ;;  %v1118_v58 = vadd.f32 %v1110_v52, %v1102_v34  ;;  %v1111_v49 = vmul.f32 %v1697_v53, %v2186_v60  ;;  %v1033_v60 = vadd.f32 1.0, %v1685_v40 }
 0x173   : > { %v1701_v61 = vpop.eup %1700  ;;  %v1107_v28 = vmul.f32 %v1699_v42, %v1099_v0 }
 0x174   : > { %v1703_v2 = vpop.eup %1702  ;;  %1724 = vtanh.f32 %v1118_v58  ;;  %1142 = vst [vmem:[%s2219_s25] sm:$0xff] %v1118_v58  ;;  %v1119_v57 = vadd.f32 %v1111_v49, %v1103_v59  ;;  %v1112_v5 = vmul.f32 %v1701_v61, %v2188_v62 }
 0x175   : > { %v1705_v56 = vpop.eup %1704  ;;  %1726 = vrcp.f32 %v1031_v54  ;;  %v1036_v31 = vadd.f32 1.0, %v1703_v2 }
 0x176   : > { %v1707_v8 = vpop.eup %1706  ;;  %1728 = vtanh.f32 %v1119_v57  ;;  %1143 = vst [vmem:[%s2219_s25 + $0x8] sm:$0xff] %v1119_v57  ;;  %v1120_v9 = vadd.f32 %v1112_v5, %v1104_v3  ;;  %v1113_v13 = vmul.f32 %v1705_v56, %v2190_v4 }
 0x177   : > { %v1709_v14 = vpop.eup %1708  ;;  %1730 = vrcp.f32 %v1032_v63  ;;  %v1108_v11 = vmul.f32 %v1707_v8, %v1100_v25 }
 0x178   : > { %v1711_v20 = vpop.eup %1710  ;;  %1732 = vtanh.f32 %v1120_v9  ;;  %1144 = vst [vmem:[%s2219_s25 + $0x10] sm:$0xff] %v1120_v9  ;;  %v1121_v62 = vadd.f32 %v1113_v13, %v1105_v12  ;;  %v1114_v23 = vmul.f32 %v1709_v14, %v2194_v7 }
 0x179   : > { %v1713_v16 = vpop.eup %1712  ;;  %1734 = vrcp.f32 %v1033_v60  ;;  %v1037_v36 = vadd.f32 1.0, %v1711_v20 }
 0x17a   : > { %v1715_v27 = vpop.eup %1714  ;;  %1736 = vtanh.f32 %v1121_v62  ;;  %1145 = vst [vmem:[%s2219_s25 + $0x18] sm:$0xff] %v1121_v62  ;;  %v1122_v4 = vadd.f32 %v1114_v23, %v1106_v22  ;;  %v1115_v29 = vmul.f32 %v1713_v16, %v2196_v10 }
 0x17b   : > { %v1717_v30 = vpop.eup %1716  ;;  %1738 = vrcp.f32 %v1034_v15  ;;  %v1109_v37 = vmul.f32 %v1715_v27, %v1101_v32 }
 0x17c   : > { %v1719_v7 = vpop.eup %1718  ;;  %1740 = vtanh.f32 %v1122_v4  ;;  %1146 = vst [vmem:[%s2219_s25 + $0x20] sm:$0xff] %v1122_v4  ;;  %v1123_v33 = vadd.f32 %v1115_v29, %v1107_v28  ;;  %v1116_v17 = vmul.f32 %v1717_v30, %v2198_v18 }
 0x17d   : > { %v1721_v35 = vpop.eup %1720  ;;  %1742 = vrcp.f32 %v1035_v24 }
 0x17e   : > { %1744 = vtanh.f32 %v1123_v33  ;;  %1147 = vst [vmem:[%s2219_s25 + $0x28] sm:$0xff] %v1123_v33  ;;  %v1124_v10 = vadd.f32 %v1116_v17, %v1108_v11  ;;  %v1117_v38 = vmul.f32 %v1721_v35, %v1719_v7  ;;  %v1723_v19 = vpop.eup %1722 }
 0x17f   : > { %1746 = vrcp.f32 %v1036_v31 }
 0x180   : > { %1748 = vtanh.f32 %v1124_v10  ;;  %1148 = vst [vmem:[%s2219_s25 + $0x30] sm:$0xff] %v1124_v10  ;;  %v1125_v39 = vadd.f32 %v1117_v38, %v1109_v37 }
 0x181   : > { %v1725_v18 = vpop.eup %1724  ;;  %1750 = vrcp.f32 %v1037_v36 }
 0x182   : > { %v1727_v40 = vpop.eup %1726  ;;  %v1134_v41 = vmul.f32 %v1725_v18, %v1723_v19  ;;  %1752 = vtanh.f32 %v1125_v39  ;;  %1149 = vst [vmem:[%s2219_s25 + $0x38] sm:$0xff] %v1125_v39 }
 0x183   : > { %v1729_v21 = vpop.eup %1728 }
 0x184   : > { %1795 = shalt.err (!%p1792_p4)
}
 0x185   : > { %s1796_s14 = scalar_lea.hbm %s2244_s27, 1024  ;;  %s1800_s25 = scalar_lea.hbm %s2337_s4, 2048 }
 0x186   : > { %p1797_p7 = scmp.ne.s32.totalorder %s2244_s27, %s1796_s14  ;;  %p1801_p2 = scmp.lt.s32.totalorder %s2244_s27, %s2337_s4 }
 0x187   : > { %p1802_p8 = scmp.lt.s32.totalorder %s1800_s25, %s1796_s14 }
 0x188   : > { %p1798_p10 = pnand %p1797_p7, %p1978_p9 }
 0x189   : > { %p1803_p12 = por %p1802_p8, %p1801_p2 }
 0x18a   : > { %p1799_p13 = pneg %p1798_p10 }
 0x18c   : > { %p1804_p0 = pnand %p1803_p12, %p1799_p13 }
 0x18e   : > { %1807 = shalt.err (!%p1804_p0)
}
 0x18f   : > { %s1899_s10 = smov 256   ;;  %s1900_s11 = smov 16   ;;  %v1731_v43 = vpop.eup %1730  ;;  %v1135_v44 = vmul.f32 %v1729_v21, %v1727_v40 }
 0x190   : > { %1462 = dma.vmem_to_hbm [thread:$0]  (%p1978_p9), %s2246_s5, 1024, %s2244_s27, %s1164_s8, %s1899_s10, %s1899_s10, %s1900_s11   ;;  %v1733_v45 = vpop.eup %1732 }
 0x191   : > { %s265_s12 = scalar_lea.vmem [#allocation5], %s1343_s24  ;;  %v1735_v46 = vpop.eup %1734  ;;  %v1136_v26 = vmul.f32 %v1733_v45, %v1731_v43  ;;  %s2282_s8 = scalar_lea.hbm %s2336_s3, %s1454_s26 }
 0x192   : > { %1150 = vst [vmem:[%s265_s12] sm:$0xff] %v1134_v41  ;;  %1151 = vst [vmem:[%s265_s12 + $0x8] sm:$0xff] %v1135_v44  ;;  %v1737_v47 = vpop.eup %1736  ;;  %s1179_s24 = sshll.u32 %s265_s12, 4  ;;  %s1159_s13 = scalar_lea.sflag [#allocation4], %s2011_s6  ;;  %s2284_s24 = int_to_ptr.vmem [resolvable:$true] %s1179_s24 }
 0x193   : > { %v1739_v48 = vpop.eup %1738  ;;  %1152 = vst [vmem:[%s265_s12 + $0x10] sm:$0xff] %v1136_v26  ;;  %v1137_v50 = vmul.f32 %v1737_v47, %v1735_v46  ;;  %s1808_s14 = scalar_lea.vmem %s2284_s24, 1024  ;;  %s1901_s21 = smov [#allocation5]  }
 0x194   : > { %v1741_v51 = vpop.eup %1740  ;;  %p1809_p1 = scmp.ne.s32.totalorder %s2284_s24, %s1808_s14  ;;  %s1812_s22 = sshll.u32 %s1901_s21, 4  ;;  %s1813_s22 = int_to_ptr.vmem [resolvable:$false] %s1812_s22 }
 0x195   : > { %v1743_v34 = vpop.eup %1742  ;;  %1153 = vst [vmem:[%s265_s12 + $0x18] sm:$0xff] %v1137_v50  ;;  %v1138_v52 = vmul.f32 %v1741_v51, %v1739_v48  ;;  %s1814_s18 = scalar_lea.vmem %s1813_s22, 2048  ;;  %p1815_p6 = scmp.lt.s32.totalorder %s2284_s24, %s1813_s22 }
 0x196   : > { %v1745_v53 = vpop.eup %1744  ;;  %p1810_p3 = pnand %p1809_p1, %p1978_p9  ;;  %p1816_p4 = scmp.lt.s32.totalorder %s1814_s18, %s1808_s14 }
 0x197   : > { %v1747_v54 = vpop.eup %1746  ;;  %1154 = vst [vmem:[%s265_s12 + $0x20] sm:$0xff] %v1138_v52  ;;  %v1139_v55 = vmul.f32 %v1745_v53, %v1743_v34 }
 0x198   : > { %v1749_v42 = vpop.eup %1748  ;;  %p1811_p5 = pneg %p1810_p3  ;;  %p1817_p7 = por %p1816_p4, %p1815_p6 }
 0x199   : > { %v1751_v58 = vpop.eup %1750  ;;  %1155 = vst [vmem:[%s265_s12 + $0x28] sm:$0xff] %v1139_v55  ;;  %v1140_v59 = vmul.f32 %v1749_v42, %v1747_v54 }
 0x19a   : > { %v1753_v49 = vpop.eup %1752  ;;  %p1818_p10 = pnand %p1817_p7, %p1811_p5 }
 0x19b   : > { %1156 = vst [vmem:[%s265_s12 + $0x30] sm:$0xff] %v1140_v59  ;;  %v1141_v61 = vmul.f32 %v1753_v49, %v1751_v58 }
 0x19d   : > { %1157 = vst [vmem:[%s265_s12 + $0x38] sm:$0xff] %v1141_v61 }
 0x19e   : > { %1821 = shalt.err (!%p1818_p10)
}
 0x19f   : > { %s1822_s26 = scalar_lea.hbm %s2282_s8, 1024  ;;  %s1826_s7 = scalar_lea.hbm %s2336_s3, 2048 }
 0x1a0   : > { %p1823_p13 = scmp.ne.s32.totalorder %s2282_s8, %s1822_s26  ;;  %p1827_p12 = scmp.lt.s32.totalorder %s2282_s8, %s2336_s3 }
 0x1a1   : > { %p1828_p0 = scmp.lt.s32.totalorder %s1826_s7, %s1822_s26 }
 0x1a2   : > { %p1824_p2 = pnand %p1823_p13, %p1978_p9 }
 0x1a3   : > { %p1829_p1 = por %p1828_p0, %p1827_p12 }
 0x1a4   : > { %p1825_p8 = pneg %p1824_p2 }
 0x1a6   : > { %p1830_p3 = pnand %p1829_p1, %p1825_p8 }
 0x1a8   : > { %1833 = shalt.err (!%p1830_p3)
}
 0x1a9   : > { %1461 = dma.vmem_to_hbm [thread:$0]  (%p1978_p9), %s2284_s24, 1024, %s2282_s8, %s1159_s13, %s1899_s10, %s1899_s10, %s1900_s11  }
 0x1aa PF: > { %s1212_s5 = sand.u32 1, %s1872_s15   ;;  %p2343_p5 = scmp.ge.s32.totalorder %s1892_s20, 2 }
 0x1ab   : > { %s1213_s27 = scalar_lea.sflag [#allocation4], %s1212_s5 }
 0x1ac   : > { %p1470_p6 = pnand %p2343_p5, %p1985_p11 }
 0x1ae   : > { %p1471_p4 = pneg %p1470_p6 }
 0x1b0   : > { %1863 = dma.done.wait (%p1471_p4), %s1213_s27, 1024  }
 0x1b1   : > { %1865 = vsyncadd (%p1471_p4), %s1213_s27, 4294966272  ;;  %s1222_s14 = scalar_lea.sflag [#allocation7], %s1212_s5 }
 0x1b2   : > { %1867 = dma.done.wait (%p1471_p4), %s1222_s14, 1024  }
 0x1b3   : > { %1869 = vsyncadd (%p1471_p4), %s1222_s14, 4294966272  ;;  %s24_s20 = sadd.s32 1, %s1892_s20   ;;  %s2344_s15 = smov %s1876_s16 }
 0x1b4   : > { %p21_p7 = scmp.ge.s32.totalorder %s24_s20, 4   ;;  %s2345_s16 = smov %s1880_s17 }
 0x1b5   : > { %s2346_s17 = smov %s1983_s29  ;;  %s2347_s18 = smov %s1888_s19 }
 0x1b6   : > { %s2348_s19 = smov %s2350_s23  ;;  %23 = sbr.rel (!%p21_p7) target bundleno = 8 (0x8), region = 97 }
 0x1bb   :  { %1227 = vsyncpa [#allocation3], 1 }
 0x1bc   :  { %1229 = vsyncpa [#allocation3 + $0x1], 1 }
 0x1bd   :  { %1230 = vsyncpa [#allocation4], 1 }
 0x1be   :  { %1232 = vsyncpa [#allocation4 + $0x1], 1 }
 0x1bf   :  { %1233 = vsyncpa [#allocation7], 1 }
 0x1c0   :  { %1235 = vsyncpa [#allocation7 + $0x1], 1 }

</bundles_post_ra>
